<compile_context>
chip_gen: v5e
topology: v5e:2x2
jax: 0.10.0
libtpu: 0.0.40
codegen_flags: <defaults>
</compile_context>

<pallas_src>
import functools

import jax
import jax.numpy as jnp
from jax.experimental import pallas as pl
from jax.experimental.pallas import tpu as pltpu


def _round_up(x, m):
    return (x + m - 1) // m * m


def _pick_batch_tile(B, block_b):
    """Pick a batch tile (multiple of 16; multiple of 128 when the grid has >1
    step so the lane-dense (1, TB) output block stays legal) and the padded B."""
    b16 = _round_up(B, 16)
    block_b = max(128, _round_up(block_b, 128))
    if b16 <= 128 or (b16 < 256 and b16 <= block_b):
        # Small batch: single grid step; block covers the whole padded batch.
        tb = b16
    else:
        # >=2 steps so both v7x TensorCores get work; lane-aligned tiles.
        n_steps = max(2, pl.cdiv(b16, block_b))
        tb = _round_up(pl.cdiv(b16, n_steps), 128)
    b_pad = _round_up(b16, tb)
    return tb, b_pad


def ncf_kernel(pg_ref, qg_ref, zm_ref,
               w1_ref, b1_ref,
               w2_ref, b2_ref,
               w3_ref, b3_ref,
               hwa_ref, hwb_ref, hb_ref,
               out_ref):
    # GMF branch: bf16 tables upcast to f32; product/accumulation stay f32 (VPU).
    gmf = pg_ref[...].astype(jnp.float32) * qg_ref[...].astype(jnp.float32)  # (TB, E)

    # MLP branch: cat(Pm, Qm) was gathered as a single (TB, 2E) bf16 stream, so
    # layer 1 is one MXU matmul against the unsplit (2E, H1) weight.
    l1 = jnp.dot(zm_ref[...], w1_ref[...],
                 preferred_element_type=jnp.float32) + b1_ref[...]
    l1 = jnp.maximum(l1, 0.0)                                                # (TB, H1)

    l2 = jnp.dot(l1.astype(jnp.bfloat16), w2_ref[...],
                 preferred_element_type=jnp.float32) + b2_ref[...]
    l2 = jnp.maximum(l2, 0.0)                                                # (TB, H2)

    l3 = jnp.dot(l2.astype(jnp.bfloat16), w3_ref[...],
                 preferred_element_type=jnp.float32) + b3_ref[...]
    l3 = jnp.maximum(l3, 0.0)                                                # (TB, H3)

    # Head: cat(gmf, l3) @ H_w^T + H_b expressed as VPU mul + lane reduction
    # (an N=1 matmul would waste a full MXU pass). H_b is an SMEM scalar.
    logits = (jnp.sum(gmf * hwa_ref[...], axis=-1, keepdims=True)
              + jnp.sum(l3 * hwb_ref[...], axis=-1, keepdims=True)
              + hb_ref[0, 0])                                                # (TB, 1)

    # Lane-dense store: one small XLU transpose per step (XLU otherwise idle)
    # turns the (TB, 1) column into a (1, TB) row for an unmasked full vst.
    out_ref[...] = jnp.transpose(jax.nn.sigmoid(logits))                     # (1, TB)


def prepare_params(params):
    """One-time layout prep: transpose Linear weights, reshape biases, cast the
    embedding tables and MXU operands to bf16."""
    E = params["embed_u_gmf"].shape[1]
    hw = params["H_w"]                                   # (1, E + H3)
    return {
        # All four embedding tables in bf16 -> halves the dominant HBM streams.
        "eu_gmf": params["embed_u_gmf"].astype(jnp.bfloat16),
        "ei_gmf": params["embed_i_gmf"].astype(jnp.bfloat16),
        "eu_mlp": params["embed_u_mlp"].astype(jnp.bfloat16),
        "ei_mlp": params["embed_i_mlp"].astype(jnp.bfloat16),
        # MLP weights feed the MXU -> bf16; biases stay f32 (VPU adds).
        "w1": params["MLP1_w"].T.astype(jnp.bfloat16),   # (2E, H1), unsplit
        "b1": params["MLP1_b"][None, :].astype(jnp.float32),
        "w2": params["MLP2_w"].T.astype(jnp.bfloat16),   # (H1, H2)
        "b2": params["MLP2_b"][None, :].astype(jnp.float32),
        "w3": params["MLP3_w"].T.astype(jnp.bfloat16),   # (H2, H3)
        "b3": params["MLP3_b"][None, :].astype(jnp.float32),
        # Head weights split at the concat boundary; stay f32 (VPU reduce).
        "hwa": hw[:, :E].astype(jnp.float32),            # (1, E)
        "hwb": hw[:, E:].astype(jnp.float32),            # (1, H3)
        "hb": params["H_b"][None, :].astype(jnp.float32),  # (1, 1) -> SMEM
    }


@functools.partial(jax.jit, static_argnames=("block_b",))
def ncf_forward(user, item, prepped, block_b=1024):
    """Jitted NCF forward: XLA embedding gather (glue) + one fused Pallas call."""
    B = user.shape[0]
    tb, b_pad = _pick_batch_tile(B, block_b)
    if b_pad != B:
        pad = b_pad - B
        user = jnp.concatenate([user, jnp.zeros((pad,), user.dtype)])
        item = jnp.concatenate([item, jnp.zeros((pad,), item.dtype)])

    # TODO(synk): eliminate the gather -> HBM -> pallas round-trip (e.g. via
    # pltpu.CompilerParams(allow_input_fusion=...) after verifying in the HLO
    # that the gathers fuse). A manual per-row DMA gather is not worthwhile at
    # E=32 (64-128 B rows; descriptor overhead dominates).
    pg = prepped["eu_gmf"][user]                          # (B_pad, E)  bf16
    qg = prepped["ei_gmf"][item]                          # (B_pad, E)  bf16
    zm = jnp.concatenate([prepped["eu_mlp"][user],
                          prepped["ei_mlp"][item]], axis=1)  # (B_pad, 2E) bf16

    E = pg.shape[1]
    h1 = prepped["w2"].shape[0]
    h2 = prepped["w3"].shape[0]
    h3 = prepped["hwb"].shape[1]

    grid = (b_pad // tb,)
    row = lambda shape: pl.BlockSpec(shape, lambda i: (i, 0))   # batch-tiled
    rep = lambda shape: pl.BlockSpec(shape, lambda i: (0, 0))   # VMEM-resident

    in_specs = [
        row((tb, E)), row((tb, E)), row((tb, 2 * E)),
        rep((2 * E, h1)), rep((1, h1)),
        rep((h1, h2)), rep((1, h2)),
        rep((h2, h3)), rep((1, h3)),
        rep((1, E)), rep((1, h3)),
        pl.BlockSpec(memory_space=pltpu.MemorySpace.SMEM),      # H_b scalar
    ]
    # Lane-dense output: (1, B_pad) slab, (1, TB) blocks -> unmasked stores.
    out_specs = pl.BlockSpec((1, tb), lambda i: (0, i))

    out = pl.pallas_call(
        ncf_kernel,
        out_shape=jax.ShapeDtypeStruct((1, b_pad), jnp.float32),
        grid=grid,
        in_specs=in_specs,
        out_specs=out_specs,
        compiler_params=pltpu.CompilerParams(
            dimension_semantics=("parallel",)),
    )(pg, qg, zm,
      prepped["w1"], prepped["b1"],
      prepped["w2"], prepped["b2"],
      prepped["w3"], prepped["b3"],
      prepped["hwa"], prepped["hwb"], prepped["hb"])

    return out.reshape(b_pad)[:B].reshape(B, 1)


def init_params(key, n_user, n_item, embed_dim, hidden_dim):
    """Deterministic init matching the PyTorch module: N(0, 0.01) weights, zero biases."""
    ks = jax.random.split(key, 8)
    std = 0.01
    h1, h2, h3 = hidden_dim
    return {
        "embed_u_mlp": std * jax.random.normal(ks[0], (n_user, embed_dim), jnp.float32),
        "embed_i_mlp": std * jax.random.normal(ks[1], (n_item, embed_dim), jnp.float32),
        "embed_u_gmf": std * jax.random.normal(ks[2], (n_user, embed_dim), jnp.float32),
        "embed_i_gmf": std * jax.random.normal(ks[3], (n_item, embed_dim), jnp.float32),
        "MLP1_w": std * jax.random.normal(ks[4], (h1, embed_dim * 2), jnp.float32),
        "MLP1_b": jnp.zeros((h1,), jnp.float32),
        "MLP2_w": std * jax.random.normal(ks[5], (h2, h1), jnp.float32),
        "MLP2_b": jnp.zeros((h2,), jnp.float32),
        "MLP3_w": std * jax.random.normal(ks[6], (h3, h2), jnp.float32),
        "MLP3_b": jnp.zeros((h3,), jnp.float32),
        "H_w": std * jax.random.normal(ks[7], (1, embed_dim + h3), jnp.float32),
        "H_b": jnp.zeros((1,), jnp.float32),
    }


def ncf_reference(user, item, params):
    """Pure-JAX f32 reference for verification."""
    pg = params["embed_u_gmf"][user]
    qg = params["embed_i_gmf"][item]
    gmf = pg * qg
    pm = params["embed_u_mlp"][user]
    qm = params["embed_i_mlp"][item]
    z = jnp.concatenate([pm, qm], axis=1)
    l1 = jax.nn.relu(z @ params["MLP1_w"].T + params["MLP1_b"])
    l2 = jax.nn.relu(l1 @ params["MLP2_w"].T + params["MLP2_b"])
    l3 = jax.nn.relu(l2 @ params["MLP3_w"].T + params["MLP3_b"])
    cat = jnp.concatenate([gmf, l3], axis=1)
    return jax.nn.sigmoid(cat @ params["H_w"].T + params["H_b"])


if __name__ == "__main__":
    n_user, n_item = 10, 12
    embed_dim = 32
    hidden_dim = (64, 32, 16)
    batch = 8

    key = jax.random.PRNGKey(0)
    kp, ku, ki = jax.random.split(key, 3)
    params = init_params(kp, n_user, n_item, embed_dim, hidden_dim)
    user = jax.random.randint(ku, (batch,), 0, n_user, dtype=jnp.int32)
    item = jax.random.randint(ki, (batch,), 0, n_item, dtype=jnp.int32)

    prepped = prepare_params(params)
    out = ncf_forward(user, item, prepped)
    out = jax.block_until_ready(out)

    ref = ncf_reference(user, item, params)
    assert out.shape == (batch, 1), out.shape
    # bf16 tables / MXU operands with f32 accumulation -> loosened tolerance.
    assert jnp.allclose(out, ref, atol=2e-3, rtol=1e-2), (out, ref)

    print("KERNEL_OK")
</pallas_src>

<mosaic_0001>
module attributes {stable_mosaic.version = 11 : i64} {
  func.func @ncf_kernel(%arg0: i32, %arg1: memref<16x32xbf16, #tpu.memory_space<vmem>>, %arg2: memref<16x32xbf16, #tpu.memory_space<vmem>>, %arg3: memref<16x64xbf16, #tpu.memory_space<vmem>>, %arg4: memref<64x64xbf16, #tpu.memory_space<vmem>>, %arg5: memref<1x64xf32, #tpu.memory_space<vmem>>, %arg6: memref<64x32xbf16, #tpu.memory_space<vmem>>, %arg7: memref<1x32xf32, #tpu.memory_space<vmem>>, %arg8: memref<32x16xbf16, #tpu.memory_space<vmem>>, %arg9: memref<1x16xf32, #tpu.memory_space<vmem>>, %arg10: memref<1x32xf32, #tpu.memory_space<vmem>>, %arg11: memref<1x16xf32, #tpu.memory_space<vmem>>, %arg12: memref<1x1xf32, #tpu.memory_space<smem>>, %arg13: memref<1x16xf32, #tpu.memory_space<vmem>>) attributes {dimension_semantics = [#tpu.dimension_semantics<parallel>], iteration_bounds = array<i64: 1>, scalar_prefetch = 0 : i64, scratch_operands = 0 : i64, tpu.core_type = #tpu.core_type<tc>, window_params = [{transform_indices = @transform_0, window_bounds = array<i64: 16, 32>}, {transform_indices = @transform_1, window_bounds = array<i64: 16, 32>}, {transform_indices = @transform_2, window_bounds = array<i64: 16, 64>}, {pipeline_mode = #tpu.pipeline_mode<synchronous>, transform_indices = @transform_3, window_bounds = array<i64: 64, 64>}, {pipeline_mode = #tpu.pipeline_mode<synchronous>, transform_indices = @transform_4, window_bounds = array<i64: 1, 64>}, {pipeline_mode = #tpu.pipeline_mode<synchronous>, transform_indices = @transform_5, window_bounds = array<i64: 64, 32>}, {pipeline_mode = #tpu.pipeline_mode<synchronous>, transform_indices = @transform_6, window_bounds = array<i64: 1, 32>}, {pipeline_mode = #tpu.pipeline_mode<synchronous>, transform_indices = @transform_7, window_bounds = array<i64: 32, 16>}, {pipeline_mode = #tpu.pipeline_mode<synchronous>, transform_indices = @transform_8, window_bounds = array<i64: 1, 16>}, {pipeline_mode = #tpu.pipeline_mode<synchronous>, transform_indices = @transform_9, window_bounds = array<i64: 1, 32>}, {pipeline_mode = #tpu.pipeline_mode<synchronous>, transform_indices = @transform_10, window_bounds = array<i64: 1, 16>}, {transform_indices = @transform_11, window_bounds = array<i64: 1, 1>}, {transform_indices = @transform_12, window_bounds = array<i64: 1, 16>}]} {
    %c0 = arith.constant 0 : index
    %c0_0 = arith.constant 0 : index
    %0 = vector.load %arg1[%c0, %c0_0] : memref<16x32xbf16, #tpu.memory_space<vmem>>, vector<16x32xbf16>
    %1 = arith.extf %0 : vector<16x32xbf16> to vector<16x32xf32>
    %c0_1 = arith.constant 0 : index
    %c0_2 = arith.constant 0 : index
    %2 = vector.load %arg2[%c0_1, %c0_2] : memref<16x32xbf16, #tpu.memory_space<vmem>>, vector<16x32xbf16>
    %3 = arith.extf %2 : vector<16x32xbf16> to vector<16x32xf32>
    %4 = arith.mulf %1, %3 : vector<16x32xf32>
    %c0_3 = arith.constant 0 : index
    %c0_4 = arith.constant 0 : index
    %5 = vector.load %arg3[%c0_3, %c0_4] : memref<16x64xbf16, #tpu.memory_space<vmem>>, vector<16x64xbf16>
    %c0_5 = arith.constant 0 : index
    %c0_6 = arith.constant 0 : index
    %6 = vector.load %arg4[%c0_5, %c0_6] : memref<64x64xbf16, #tpu.memory_space<vmem>>, vector<64x64xbf16>
    %cst = arith.constant dense<0.000000e+00> : vector<16x64xf32>
    %7 = tpu.matmul %5, %6, %cst {dimension_numbers = #tpu.dot_dimension_numbers<[1], [0], [0], [1], [0, 0, 1, 1], [], []>} : vector<16x64xbf16>, vector<64x64xbf16>, vector<16x64xf32> -> vector<16x64xf32>
    %c0_7 = arith.constant 0 : index
    %c0_8 = arith.constant 0 : index
    %8 = vector.load %arg5[%c0_7, %c0_8] : memref<1x64xf32, #tpu.memory_space<vmem>>, vector<1x64xf32>
    %9 = vector.broadcast %8 : vector<1x64xf32> to vector<16x64xf32>
    %10 = arith.addf %7, %9 : vector<16x64xf32>
    %cst_9 = arith.constant 0.000000e+00 : f32
    %11 = vector.broadcast %cst_9 : f32 to vector<16x64xf32>
    %12 = arith.maximumf %10, %11 : vector<16x64xf32>
    %13 = arith.truncf %12 : vector<16x64xf32> to vector<16x64xbf16>
    %c0_10 = arith.constant 0 : index
    %c0_11 = arith.constant 0 : index
    %14 = vector.load %arg6[%c0_10, %c0_11] : memref<64x32xbf16, #tpu.memory_space<vmem>>, vector<64x32xbf16>
    %cst_12 = arith.constant dense<0.000000e+00> : vector<16x32xf32>
    %15 = tpu.matmul %13, %14, %cst_12 {dimension_numbers = #tpu.dot_dimension_numbers<[1], [0], [0], [1], [0, 0, 1, 1], [], []>} : vector<16x64xbf16>, vector<64x32xbf16>, vector<16x32xf32> -> vector<16x32xf32>
    %c0_13 = arith.constant 0 : index
    %c0_14 = arith.constant 0 : index
    %16 = vector.load %arg7[%c0_13, %c0_14] : memref<1x32xf32, #tpu.memory_space<vmem>>, vector<1x32xf32>
    %17 = vector.broadcast %16 : vector<1x32xf32> to vector<16x32xf32>
    %18 = arith.addf %15, %17 : vector<16x32xf32>
    %cst_15 = arith.constant 0.000000e+00 : f32
    %19 = vector.broadcast %cst_15 : f32 to vector<16x32xf32>
    %20 = arith.maximumf %18, %19 : vector<16x32xf32>
    %21 = arith.truncf %20 : vector<16x32xf32> to vector<16x32xbf16>
    %c0_16 = arith.constant 0 : index
    %c0_17 = arith.constant 0 : index
    %22 = vector.load %arg8[%c0_16, %c0_17] : memref<32x16xbf16, #tpu.memory_space<vmem>>, vector<32x16xbf16>
    %cst_18 = arith.constant dense<0.000000e+00> : vector<16x16xf32>
    %23 = tpu.matmul %21, %22, %cst_18 {dimension_numbers = #tpu.dot_dimension_numbers<[1], [0], [0], [1], [0, 0, 1, 1], [], []>} : vector<16x32xbf16>, vector<32x16xbf16>, vector<16x16xf32> -> vector<16x16xf32>
    %c0_19 = arith.constant 0 : index
    %c0_20 = arith.constant 0 : index
    %24 = vector.load %arg9[%c0_19, %c0_20] : memref<1x16xf32, #tpu.memory_space<vmem>>, vector<1x16xf32>
    %25 = vector.broadcast %24 : vector<1x16xf32> to vector<16x16xf32>
    %26 = arith.addf %23, %25 : vector<16x16xf32>
    %cst_21 = arith.constant 0.000000e+00 : f32
    %27 = vector.broadcast %cst_21 : f32 to vector<16x16xf32>
    %28 = arith.maximumf %26, %27 : vector<16x16xf32>
    %c0_22 = arith.constant 0 : index
    %c0_23 = arith.constant 0 : index
    %29 = vector.load %arg10[%c0_22, %c0_23] : memref<1x32xf32, #tpu.memory_space<vmem>>, vector<1x32xf32>
    %30 = vector.broadcast %29 : vector<1x32xf32> to vector<16x32xf32>
    %31 = arith.mulf %4, %30 : vector<16x32xf32>
    %cst_24 = arith.constant dense<0.000000e+00> : vector<16xf32>
    %32 = vector.multi_reduction <add>, %31, %cst_24 [1] : vector<16x32xf32> to vector<16xf32>
    %33 = vector.shape_cast %32 : vector<16xf32> to vector<16x1xf32>
    %c0_25 = arith.constant 0 : index
    %c0_26 = arith.constant 0 : index
    %34 = vector.load %arg11[%c0_25, %c0_26] : memref<1x16xf32, #tpu.memory_space<vmem>>, vector<1x16xf32>
    %35 = vector.broadcast %34 : vector<1x16xf32> to vector<16x16xf32>
    %36 = arith.mulf %28, %35 : vector<16x16xf32>
    %cst_27 = arith.constant dense<0.000000e+00> : vector<16xf32>
    %37 = vector.multi_reduction <add>, %36, %cst_27 [1] : vector<16x16xf32> to vector<16xf32>
    %38 = vector.shape_cast %37 : vector<16xf32> to vector<16x1xf32>
    %39 = arith.addf %33, %38 : vector<16x1xf32>
    %c0_28 = arith.constant 0 : index
    %c0_29 = arith.constant 0 : index
    %40 = memref.load %arg12[%c0_28, %c0_29] : memref<1x1xf32, #tpu.memory_space<smem>>
    %41 = vector.broadcast %40 : f32 to vector<16x1xf32>
    %42 = arith.addf %39, %41 : vector<16x1xf32>
    %43 = arith.negf %42 : vector<16x1xf32>
    %44 = math.exp %43 : vector<16x1xf32>
    %cst_30 = arith.constant 1.000000e+00 : f32
    %45 = vector.broadcast %cst_30 : f32 to vector<16x1xf32>
    %46 = arith.addf %45, %44 : vector<16x1xf32>
    %47 = arith.divf %45, %46 : vector<16x1xf32>
    %48 = tpu.transpose %47, [1, 0] : vector<16x1xf32> -> vector<1x16xf32>
    %c0_31 = arith.constant 0 : index
    %c0_32 = arith.constant 0 : index
    %49 = vector.load %arg13[%c0_31, %c0_32] : memref<1x16xf32, #tpu.memory_space<vmem>>, vector<1x16xf32>
    tpu.vector_store %arg13[%c0_31, %c0_32], %48 {strides = array<i32>} : memref<1x16xf32, #tpu.memory_space<vmem>>, vector<1x16xf32>,
    return
  }
  func.func @transform_0(%arg0: i32) -> (i32, i32) {
    %c0_i32 = arith.constant 0 : i32
    %c0_i32_0 = arith.constant 0 : i32
    return %arg0, %c0_i32 : i32, i32
  }
  func.func @transform_1(%arg0: i32) -> (i32, i32) {
    %c0_i32 = arith.constant 0 : i32
    %c0_i32_0 = arith.constant 0 : i32
    return %arg0, %c0_i32 : i32, i32
  }
  func.func @transform_2(%arg0: i32) -> (i32, i32) {
    %c0_i32 = arith.constant 0 : i32
    %c0_i32_0 = arith.constant 0 : i32
    return %arg0, %c0_i32 : i32, i32
  }
  func.func @transform_3(%arg0: i32) -> (i32, i32) {
    %c0_i32 = arith.constant 0 : i32
    %c0_i32_0 = arith.constant 0 : i32
    %c0_i32_1 = arith.constant 0 : i32
    return %c0_i32, %c0_i32_0 : i32, i32
  }
  func.func @transform_4(%arg0: i32) -> (i32, i32) {
    %c0_i32 = arith.constant 0 : i32
    %c0_i32_0 = arith.constant 0 : i32
    %c0_i32_1 = arith.constant 0 : i32
    return %c0_i32, %c0_i32_0 : i32, i32
  }
  func.func @transform_5(%arg0: i32) -> (i32, i32) {
    %c0_i32 = arith.constant 0 : i32
    %c0_i32_0 = arith.constant 0 : i32
    %c0_i32_1 = arith.constant 0 : i32
    return %c0_i32, %c0_i32_0 : i32, i32
  }
  func.func @transform_6(%arg0: i32) -> (i32, i32) {
    %c0_i32 = arith.constant 0 : i32
    %c0_i32_0 = arith.constant 0 : i32
    %c0_i32_1 = arith.constant 0 : i32
    return %c0_i32, %c0_i32_0 : i32, i32
  }
  func.func @transform_7(%arg0: i32) -> (i32, i32) {
    %c0_i32 = arith.constant 0 : i32
    %c0_i32_0 = arith.constant 0 : i32
    %c0_i32_1 = arith.constant 0 : i32
    return %c0_i32, %c0_i32_0 : i32, i32
  }
  func.func @transform_8(%arg0: i32) -> (i32, i32) {
    %c0_i32 = arith.constant 0 : i32
    %c0_i32_0 = arith.constant 0 : i32
    %c0_i32_1 = arith.constant 0 : i32
    return %c0_i32, %c0_i32_0 : i32, i32
  }
  func.func @transform_9(%arg0: i32) -> (i32, i32) {
    %c0_i32 = arith.constant 0 : i32
    %c0_i32_0 = arith.constant 0 : i32
    %c0_i32_1 = arith.constant 0 : i32
    return %c0_i32, %c0_i32_0 : i32, i32
  }
  func.func @transform_10(%arg0: i32) -> (i32, i32) {
    %c0_i32 = arith.constant 0 : i32
    %c0_i32_0 = arith.constant 0 : i32
    %c0_i32_1 = arith.constant 0 : i32
    return %c0_i32, %c0_i32_0 : i32, i32
  }
  func.func @transform_11(%arg0: i32) -> (i32, i32) {
    %c0_i32 = arith.constant 0 : i32
    %c0_i32_0 = arith.constant 0 : i32
    %c0_i32_1 = arith.constant 0 : i32
    return %c0_i32, %c0_i32_0 : i32, i32
  }
  func.func @transform_12(%arg0: i32) -> (i32, i32) {
    %c0_i32 = arith.constant 0 : i32
    %c0_i32_0 = arith.constant 0 : i32
    return %c0_i32, %arg0 : i32, i32
  }
}

</mosaic_0001>

<bundles_post_ra>
// kernel: ncf_forward.1
= control target key start
LH: loop header
LB: loop body
LE: loop exit
PB: predicated region body
PF: predicated region fallthrough
CT: control target
= control target key end

     0   :  { %vm96_vm0 = vcmask 523264   ;;  %vm193_vm1 = vcmask 261120   ;;  %vm231_vm2 = vcmask 130048   ;;  %vm314_vm11 = vcmask 122880   ;;  %s532_s3 = inlined_call_operand.vmem [shape: bf16[64,64], index: 3, kind: input, shape index: {}]   ;;  %s533_s4 = inlined_call_operand.vmem [shape: f32[1,64], index: 4, kind: input, shape index: {}]   ;;  %s534_s2 = inlined_call_operand.vmem [shape: bf16[16,64], index: 2, kind: input, shape index: {}]   ;;  %s535_s6 = inlined_call_operand.vmem [shape: f32[1,32], index: 6, kind: input, shape index: {}]   ;;  %s536_s5 = inlined_call_operand.vmem [shape: bf16[64,32], index: 5, kind: input, shape index: {}]   ;;  %s537_s8 = inlined_call_operand.vmem [shape: f32[1,16], index: 8, kind: input, shape index: {}]   ;;  %s538_s7 = inlined_call_operand.vmem [shape: bf16[32,16], index: 7, kind: input, shape index: {}]   ;;  %s539_s9 = inlined_call_operand.vmem [shape: f32[1,32], index: 9, kind: input, shape index: {}]   ;;  %s540_s10 = inlined_call_operand.vmem [shape: f32[1,16], index: 10, kind: input, shape index: {}]   ;;  %s541_s0 = inlined_call_operand.vmem [shape: bf16[16,32], index: 0, kind: input, shape index: {}]   ;;  %s542_s1 = inlined_call_operand.vmem [shape: bf16[16,32], index: 1, kind: input, shape index: {}]   ;;  %s543_s11 = inlined_call_operand.<no memory space> [shape: f32[1,1], index: 11, kind: input, shape index: {}]   ;;  %s544_s12 = inlined_call_operand.vmem [shape: f32[1,16], index: 12, kind: output, shape index: {}]  }
   0x1   :  { %v373_v0 = vld [vmem:[%s532_s3 + $0x18] sm:$0xff]  ;;  %v372_v1 = vld [vmem:[%s532_s3 + $0x10] sm:$0xff]  ;;  %v371_v2 = vld [vmem:[%s532_s3 + $0x8] sm:$0xff]  ;;  %v241_v54 = vstv %s543_s11 }
   0x2   :  { %104 = vmatpush.bf16.msra.mxu0 %v373_v0  ;;  %v370_v3 = vld [vmem:[%s532_s3] sm:$0xff]  ;;  %v377_v5 = vld [vmem:[%s536_s5 + $0x18] sm:$0xff]  ;;  %v376_v6 = vld [vmem:[%s536_s5 + $0x10] sm:$0xff] }
   0x3   :  { %v369_v4 = vld [vmem:[%s534_s2] sm:$0xff]  ;;  %160 = vmatpush.bf16.msra.mxu1 %v377_v5  ;;  %v375_v7 = vld [vmem:[%s536_s5 + $0x8] sm:$0xff] }
   0x4   :  { %v374_v8 = vld [vmem:[%s536_s5] sm:$0xff]  ;;  %v379_v17 = vld [vmem:[%s538_s7 + $0x8] sm:$0xff] }
   0x5   :  { %v389_v10 = vld [vmem:[%s533_s4] ss:$0 sm:$0xff]  ;;  %203 = vmatpush.bf16.msra.mxu2 %v379_v17 }
   0x6   :  { %105 = vmatpush.bf16.msra.mxu0 %v372_v1  ;;  %v378_v18 = vld [vmem:[%s538_s7] sm:$0xff] }
   0x7   :  { %161 = vmatpush.bf16.msra.mxu1 %v376_v6  ;;  %v390_v20 = vld [vmem:[%s535_s6] ss:$0 sm:$0xff] }
   0x8   :  { %v381_v27 = vld [vmem:[%s541_s0] sm:$0xff]  }
   0x9   :  { %204 = vmatpush.bf16.msra.mxu2 %v378_v18  ;;  %v385_v28 = vld [vmem:[%s542_s1] sm:$0xff]   ;;  %v382_v29 = vunpack.c.l.bf16 %v381_v27  ;;  %v383_v35 = vunpack.c.h.bf16 %v381_v27 }
   0xa   :  { %106 = vmatpush.bf16.msra.mxu0 %v371_v2  ;;  %v386_v30 = vunpack.c.l.bf16 %v385_v28  ;;  %v392_v32 = vld [vmem:[%s539_s9] ss:$0 sm:$0xff]  ;;  %v387_v36 = vunpack.c.h.bf16 %v385_v28 }
   0xb   :  { %162 = vmatpush.bf16.msra.mxu1 %v375_v7  ;;  %v391_v40 = vld [vmem:[%s537_s8] ss:$0 sm:$0xff] }
   0xc   :  { %v51_v31 = vmul.f32 %v386_v30, %v382_v29  ;;  %v52_v37 = vmul.f32 %v387_v36, %v383_v35  ;;  %v393_v43 = vld [vmem:[%s540_s10] ss:$0 sm:$0xff] }
   0xe   :  { %107 = vmatpush.bf16.msra.mxu0 %v370_v3  ;;  %v217_v33 = vmul.f32 %v392_v32, %v51_v31  ;;  %v218_v38 = vmul.f32 %v392_v32, %v52_v37 }
   0xf   :  { %163 = vmatpush.bf16.msra.mxu1 %v374_v8 }
  0x10   :  { %v219_v34 = vsel %vm193_vm1, %v217_v33, 0.0  ;;  %v222_v39 = vsel %vm193_vm1, %v218_v38, 0.0 }
  0x11   :  { %340 = vmatmul.msk.bf16.vlgmr.msra.gmra.mxu0 %vm96_vm0, %v369_v4  ;;  %220 = vadd.xlane.f32.xlu0 %v219_v34 }
  0x12   :  { %223 = vadd.xlane.f32.xlu1 %v222_v39 }
  0x84   :  { %v221_v52 = vpop.xlane.xlu0 %220 }
  0x85   :  { %v224_v53 = vpop.xlane.xlu1 %223 }
  0x8e   :  { %v109_v9 = vpop.f32.mrf.mxu0 }
  0x8f   :  { %v110_v11 = vadd.f32 %v389_v10, %v109_v9 }
  0x91   :  { %v114_v14 = vmax.f32 %v110_v11, 0.0 }
  0x96   :  { %v111_v12 = vpop.f32.mrf.mxu0 }
  0x97   :  { %v112_v13 = vadd.f32 %v389_v10, %v111_v12 }
  0x99   :  { %v115_v15 = vmax.f32 %v112_v13, 0.0 }
  0x9b   :  { %v116_v16 = vpack.c.bf16 %v115_v15, %v114_v14 }
  0x9d   :  { %357 = vmatmul.msk.bf16.vlgmr.msra.gmra.mxu1 %vm96_vm0, %v116_v16 }
 0x11a   :  { %v165_v19 = vpop.f32.mrf.mxu1 }
 0x11b   :  { %v166_v21 = vadd.f32 %v390_v20, %v165_v19 }
 0x11d   :  { %v170_v24 = vmax.f32 %v166_v21, 0.0 }
 0x122   :  { %v167_v22 = vpop.f32.mrf.mxu1 }
 0x123   :  { %v168_v23 = vadd.f32 %v390_v20, %v167_v22 }
 0x125   :  { %v171_v25 = vmax.f32 %v168_v23, 0.0 }
 0x127   :  { %v172_v26 = vpack.c.bf16 %v171_v25, %v170_v24 }
 0x129   :  { %366 = vmatmul.msk.bf16.vlgmr.msra.gmra.mxu2 %vm193_vm1, %v172_v26 }
 0x1ac   :  { %v206_v41 = vpop.f32.mrf.mxu2 }
 0x1ad   :  { %v207_v42 = vadd.f32 %v391_v40, %v206_v41 }
 0x1af   :  { %v211_v44 = vmax.f32 %v207_v42, 0.0 }
 0x1b1   :  { %v229_v45 = vmul.f32 %v393_v43, %v211_v44 }
 0x1b3   :  { %v232_v46 = vsel %vm231_vm2, %v229_v45, 0.0 }
 0x1b4   :  { %v208_v47 = vpop.f32.mrf.mxu2  ;;  %233 = vadd.xlane.f32.xlu0 %v232_v46 }
 0x1b5   :  { %v209_v48 = vadd.f32 %v391_v40, %v208_v47 }
 0x1b7   :  { %v212_v49 = vmax.f32 %v209_v48, 0.0 }
 0x1b9   :  { %v230_v50 = vmul.f32 %v393_v43, %v212_v49 }
 0x1bb   :  { %v235_v51 = vsel %vm231_vm2, %v230_v50, 0.0 }
 0x1bc   :  { %236 = vadd.xlane.f32.xlu1 %v235_v51 }
 0x227   :  { %v234_v55 = vpop.xlane.xlu0 %233 }
 0x228   :  { %v238_v56 = vadd.f32 %v234_v55, %v221_v52 }
 0x22a   :  { %v242_v57 = vadd.f32 %v241_v54, %v238_v56 }
 0x22c   :  { %v367_v58 = vmul.f32 -1.442695, %v242_v57 }
 0x22e   :  { %394 = vpow2.f32 %v367_v58 }
 0x22f   :  { %v237_v59 = vpop.xlane.xlu1 %236 }
 0x230   :  { %v239_v60 = vadd.f32 %v237_v59, %v224_v53 }
 0x232   :  { %v243_v61 = vadd.f32 %v241_v54, %v239_v60 }
 0x234   :  { %v395_v62 = vpop.eup %394  ;;  %v368_v63 = vmul.f32 -1.442695, %v243_v61 }
 0x235   :  { %v250_v0 = vadd.f32 1.0, %v395_v62 }
 0x236   :  { %396 = vpow2.f32 %v368_v63 }
 0x237   :  { %398 = vrcp.f32 %v250_v0  ;;  %v263_v6 = vand.u32 2147483648, %v250_v0  ;;  %v261_v8 = vand.u32 2147483647, %v250_v0  ;;  %vm257_vm4 = vweird.f32 %v250_v0 }
 0x239   :  { %v264_v11 = vor.u32 1.1754944e-38, %v263_v6  ;;  %vm262_vm6 = vcmp.eq.f32.partialorder %v261_v8, 8.507059e+37 }
 0x23c   :  { %v397_v1 = vpop.eup %396 }
 0x23d   :  { %v399_v2 = vpop.eup %398  ;;  %v251_v3 = vadd.f32 1.0, %v397_v1 }
 0x23e   :  { %v253_v4 = vmul.f32 %v399_v2, %v250_v0  ;;  %vm258_vm3 = vweird.f32 %v399_v2 }
 0x23f   :  { %400 = vrcp.f32 %v251_v3  ;;  %vm259_vm5 = vmor %vm257_vm4, %vm258_vm3  ;;  %v278_v16 = vand.u32 2147483648, %v251_v3  ;;  %v276_v18 = vand.u32 2147483647, %v251_v3  ;;  %vm272_vm8 = vweird.f32 %v251_v3 }
 0x240   :  { %v254_v5 = vsub.f32 1.0, %v253_v4 }
 0x241   :  { %v279_v20 = vor.u32 1.1754944e-38, %v278_v16  ;;  %vm277_vm10 = vcmp.eq.f32.partialorder %v276_v18, 8.507059e+37 }
 0x242   :  { %v255_v7 = vmul.f32 %v399_v2, %v254_v5 }
 0x244   :  { %v256_v9 = vadd.f32 %v399_v2, %v255_v7 }
 0x245   :  { %v401_v10 = vpop.eup %400 }
 0x246   :  { %v260_v12 = vsel %vm259_vm5, %v399_v2, %v256_v9  ;;  %v268_v13 = vmul.f32 %v401_v10, %v251_v3  ;;  %vm273_vm7 = vweird.f32 %v401_v10 }
 0x247   :  { %v265_v14 = vsel %vm262_vm6, %v264_v11, %v260_v12  ;;  %vm274_vm9 = vmor %vm272_vm8, %vm273_vm7 }
 0x248   :  { %282 = vxpose.xlu2.b32.start [1/2] (short) (narrow) %v265_v14, 8  ;;  %v269_v15 = vsub.f32 1.0, %v268_v13 }
 0x24a   :  { %v270_v17 = vmul.f32 %v401_v10, %v269_v15 }
 0x24c   :  { %v271_v19 = vadd.f32 %v401_v10, %v270_v17 }
 0x24e   :  { %v275_v21 = vsel %vm274_vm9, %v401_v10, %v271_v19 }
 0x24f   :  { %v280_v22 = vsel %vm277_vm10, %v279_v20, %v275_v21 }
 0x250   :  { %283 = vxpose.xlu2.b32.end [2/2] (short) (narrow) %v280_v22, 8 }
 0x2e1   :  { %v298_v23 = vpop.trf.xlu2 }
 0x2e2   :  { %315 = vst.msk [vmem:[%s544_s12] sm:$0x1] %vm314_vm11, %v298_v23 }

</bundles_post_ra>
